<compile_context>
chip_gen: v7x
topology: tpu7x:2x2x1
jax: 0.10.0
libtpu: 0.0.40
codegen_flags: <defaults>
</compile_context>

<pallas_src>
import jax
import jax.numpy as jnp
from jax.experimental import pallas as pl
from jax.experimental.pallas import tpu as pltpu

LANE = 128


def _scale_kernel(w_ref, x_ref, o_ref):
    # w_ref: (1, 1) float32 scalar in SMEM; x_ref / o_ref: VMEM tiles (2-D lane-dense or 1-D).
    # Compute in f32 (matches PyTorch promotion for an f32 Parameter), cast on store.
    o_ref[...] = (x_ref[...].astype(jnp.float32) * w_ref[0, 0]).astype(o_ref.dtype)


def _tpu_plan():
    """Generation-aware block-size / grid plan for this HBM-bound op."""
    kind = ""
    try:
        kind = jax.devices()[0].device_kind.lower()
    except Exception:
        pass
    if "v7" in kind or "7x" in kind:
        # v7x: 2 TCs, ~3.2 TB/s HBM, 64 MiB VMEM (32 MiB scoped default).  Bigger blocks keep
        # per-step DMA >> ~0.35 us fixed overhead; raise the scoped limit so in+out double
        # buffers of 8 MiB blocks fit; >=4 steps gives each TC >=2 blocks (pipeline overlap).
        return dict(block_bytes=8 << 20, vmem_limit=48 << 20, min_steps=4)
    # v5e / v6e (single TensorCore) or unknown: 2 MiB blocks are already on the HBM roofline
    # and 2 arrays x 2 buffers x 2 MiB = 8 MiB fits even the 16 MiB v5e scoped default.
    # No forced split: an extra grid step on a 1-TC chip is pure per-step overhead.
    return dict(block_bytes=2 << 20, vmem_limit=None, min_steps=1)


def _round_down(v, m):
    return max(m, (v // m) * m)


def scale(x: jax.Array, weight: jax.Array, *, donate_x: bool = False) -> jax.Array:
    """Elementwise x * weight (weight is a scalar parameter of shape (1,))."""
    orig_shape = x.shape
    out_dtype = jnp.promote_types(x.dtype, weight.dtype)
    n = int(x.size)
    if n == 0:
        return (x.astype(out_dtype) * weight.astype(out_dtype).reshape(())).reshape(orig_shape)

    in_item = jnp.dtype(x.dtype).itemsize
    out_item = jnp.dtype(out_dtype).itemsize
    max_item = max(in_item, out_item)
    # Sublane packing multiple: 8 for 4-byte, 16 for 2-byte, 32 for 1-byte dtypes;
    # use the strictest of input/output dtypes.
    sub = max(8, 32 // min(in_item, out_item))

    plan = _tpu_plan()
    block_bytes, vmem_limit, min_steps = plan["block_bytes"], plan["vmem_limit"], plan["min_steps"]

    # Scalar weight lives in SMEM as a 32-bit scalar.
    w_smem = weight.reshape(1, 1).astype(jnp.float32)

    if n % LANE == 0:
        # Lane-dense 2-D view, blocked on rows.  No pad, no trailing slice.
        rows = n // LANE
        x_view = x.reshape(rows, LANE)
        out_shape = jax.ShapeDtypeStruct((rows, LANE), out_dtype)
        row_bytes = LANE * max_item
        if min_steps <= 1 and rows * row_bytes <= block_bytes:
            block_rows = rows                                   # single whole-array block
        else:
            block_rows = _round_down(block_bytes // row_bytes, sub)
            if min_steps > 1:
                block_rows = min(block_rows, _round_down(rows // min_steps, sub))
            block_rows = min(block_rows, rows)
        grid = (pl.cdiv(rows, block_rows),)
        block_shape = (block_rows, LANE)
        index_map = lambda i: (i, 0)
    else:
        # Ragged flat size: block the flat (n,) array directly in 1-D.  Blocks are a multiple
        # of sub*128; Pallas masks the partial final block -> no jnp.pad / out[:n] HBM passes.
        x_view = x.reshape(n)
        out_shape = jax.ShapeDtypeStruct((n,), out_dtype)
        unit = sub * LANE
        if min_steps <= 1 and n * max_item <= block_bytes:
            block_elems = n                                     # single whole-array block
        else:
            block_elems = _round_down(block_bytes // max_item, unit)
            if min_steps > 1:
                block_elems = min(block_elems, _round_down(n // min_steps, unit))
            block_elems = min(block_elems, n)
        grid = (pl.cdiv(n, block_elems),)
        block_shape = (block_elems,)
        index_map = lambda i: (i,)

    # Alias x -> out only when the caller actually donates x (otherwise XLA inserts a copy).
    io_aliases = {1: 0} if (donate_x and out_dtype == x.dtype) else {}

    out = pl.pallas_call(
        _scale_kernel,
        out_shape=out_shape,
        grid=grid,
        in_specs=[
            pl.BlockSpec(memory_space=pltpu.MemorySpace.SMEM),   # scalar weight
            pl.BlockSpec(block_shape, index_map),                # x tile
        ],
        out_specs=pl.BlockSpec(block_shape, index_map),
        compiler_params=pltpu.CompilerParams(
            dimension_semantics=("parallel",),
            vmem_limit_bytes=vmem_limit,
        ),
        cost_estimate=pl.CostEstimate(
            flops=n, transcendentals=0,
            bytes_accessed=n * (in_item + out_item)),
        input_output_aliases=io_aliases,
    )(w_smem, x_view)

    # TODO(synk): in a real model this scale should be fused into a neighboring kernel/op
    # instead of paying a dedicated full HBM read+write pass as a standalone pallas_call.
    return out.reshape(orig_shape)


if __name__ == "__main__":
    key = jax.random.PRNGKey(0)

    # NCHW feature map, flat size divisible by 128 -> lane-dense 2-D path.
    x = jax.random.normal(key, (2, 4, 16, 16), dtype=jnp.float32)
    weight = jnp.ones((1,), dtype=jnp.float32)  # matches nn.Parameter(torch.ones(1))
    y = scale(x, weight)
    jax.block_until_ready(y)
    assert y.shape == x.shape and y.dtype == jnp.float32
    assert jnp.allclose(y, x * weight, atol=1e-6, rtol=1e-6)

    # Awkward shape (flat size not divisible by 128) -> flat 1-D path, no pad / no slice.
    x2 = jax.random.normal(jax.random.PRNGKey(1), (3, 5, 7), dtype=jnp.float32)
    w2 = jnp.full((1,), 1.5, dtype=jnp.float32)
    y2 = scale(x2, w2)
    jax.block_until_ready(y2)
    assert y2.shape == x2.shape and y2.dtype == jnp.float32
    assert jnp.allclose(y2, x2 * w2, atol=1e-6, rtol=1e-6)

    # Mixed precision: bf16 activations * f32 parameter promote to f32 (PyTorch parity).
    x3 = jax.random.normal(jax.random.PRNGKey(2), (4, 64), dtype=jnp.bfloat16)
    w3 = jnp.full((1,), 0.75, dtype=jnp.float32)
    y3 = scale(x3, w3)
    jax.block_until_ready(y3)
    assert y3.dtype == jnp.float32
    assert jnp.allclose(y3, x3.astype(jnp.float32) * w3, atol=1e-6, rtol=1e-6)

    print("KERNEL_OK")
</pallas_src>

<mosaic_0001>
module attributes {stable_mosaic.version = 11 : i64} {
  func.func @_scale_kernel(%arg0: i32, %arg1: memref<1x1xf32, #tpu.memory_space<smem>>, %arg2: memref<16x128xf32, #tpu.memory_space<vmem>>, %arg3: memref<16x128xf32, #tpu.memory_space<vmem>>) attributes {dimension_semantics = [#tpu.dimension_semantics<parallel>], iteration_bounds = array<i64: 1>, scalar_prefetch = 0 : i64, scratch_operands = 0 : i64, tpu.core_type = #tpu.core_type<tc>, window_params = [{transform_indices = @transform_0, window_bounds = array<i64: 1, 1>}, {transform_indices = @transform_1, window_bounds = array<i64: 16, 128>}, {transform_indices = @transform_2, window_bounds = array<i64: 16, 128>}]} {
    %c0 = arith.constant 0 : index
    %c0_0 = arith.constant 0 : index
    %0 = vector.load %arg2[%c0, %c0_0] : memref<16x128xf32, #tpu.memory_space<vmem>>, vector<16x128xf32>
    %c0_1 = arith.constant 0 : index
    %c0_2 = arith.constant 0 : index
    %1 = memref.load %arg1[%c0_1, %c0_2] : memref<1x1xf32, #tpu.memory_space<smem>>
    %2 = vector.broadcast %1 : f32 to vector<16x128xf32>
    %3 = arith.mulf %0, %2 : vector<16x128xf32>
    %c0_3 = arith.constant 0 : index
    %c0_4 = arith.constant 0 : index
    %4 = vector.load %arg3[%c0_3, %c0_4] : memref<16x128xf32, #tpu.memory_space<vmem>>, vector<16x128xf32>
    tpu.vector_store %arg3[%c0_3, %c0_4], %3 {strides = array<i32>} : memref<16x128xf32, #tpu.memory_space<vmem>>, vector<16x128xf32>,
    return
  }
  func.func @transform_0(%arg0: i32) -> (i32, i32) {
    %c0_i32 = arith.constant 0 : i32
    %c0_i32_0 = arith.constant 0 : i32
    %c0_i32_1 = arith.constant 0 : i32
    return %c0_i32, %c0_i32_0 : i32, i32
  }
  func.func @transform_1(%arg0: i32) -> (i32, i32) {
    %c0_i32 = arith.constant 0 : i32
    %c0_i32_0 = arith.constant 0 : i32
    return %arg0, %c0_i32 : i32, i32
  }
  func.func @transform_2(%arg0: i32) -> (i32, i32) {
    %c0_i32 = arith.constant 0 : i32
    %c0_i32_0 = arith.constant 0 : i32
    return %arg0, %c0_i32 : i32, i32
  }
}

</mosaic_0001>

<bundles_post_ra>
// kernel: tpu_custom_call.1
= control target key start
LH: loop header
LB: loop body
LE: loop exit
PB: predicated region body
PF: predicated region fallthrough
CT: control target
= control target key end

     0   :  { %8 = vsyncpa [#allocation4], 0  ;;  %s156_s0 = inlined_call_operand.<no memory space> [shape: f32[1,1], index: 0, kind: input, shape index: {}]   ;;  %s157_s1 = inlined_call_operand.hbm [shape: f32[16,128], index: 1, kind: input, shape index: {}]   ;;  %s158_s2 = inlined_call_operand.hbm [shape: f32[16,128], index: 2, kind: output, shape index: {}]  }
   0x1   :  { %9 = vsyncpa [#allocation5], 0  ;;  %s104_s9 = smov [#allocation3]   ;;  %s56_s13 = scalar_lea.hbm %s157_s1, 256 }
   0x2   :  { %s17_s10 = sshll.u32 %s104_s9, 4  ;;  %p57_p0 = scmp.ne.s32.totalorder %s157_s1, %s56_s13  ;;  %s18_s10 = int_to_ptr.vmem [resolvable:$true] %s17_s10 }
   0x3   :  { %p60_p1 = scmp.lt.u32.totalorder %s56_s13, %s157_s1 }
   0x5   :  { %p62_p2 = pnand %p60_p1, %p57_p0 }
   0x7   :  { %65 = shalt.err (!%p62_p2)
}
   0x8   :  { %s66_s18 = scalar_lea.vmem %s18_s10, 256  ;;  %p71_p4 = scmp.lt.s32.totalorder %s18_s10, %s18_s10 }
   0x9   :  { %p67_p3 = scmp.ne.s32.totalorder %s18_s10, %s66_s18  ;;  %p72_p5 = scmp.lt.s32.totalorder %s66_s18, %s66_s18 }
   0xb   :  { %p73_p6 = por %p72_p5, %p71_p4 }
   0xd   :  { %p74_p7 = pnand %p73_p6, %p67_p3 }
   0xf   :  { %77 = shalt.err (!%p74_p7)
}
  0x10   :  { %s105_s19 = smov 128   ;;  %s106_s20 = smov 8  }
  0x11   :  { %23 = dma.hbm_to_vmem [thread:$0]  %s157_s1, 256, %s18_s10, [#allocation4], %s105_s19, %s105_s19, %s106_s20  }
  0x12   :  { %100 = dma.done.wait [#allocation4], 256  }
  0x13   :  { %101 = vsyncadd [#allocation4], 4294967040  ;;  %v30_v0 = vstv %s156_s0  ;;  %s107_s25 = smov [#allocation6]   ;;  %v27_v1 = vld [vmem:[#allocation3] sm:$0xff]  ;;  %v28_v2 = vld [vmem:[#allocation3 + $0x8] sm:$0xff] }
  0x14   :  { %s40_s26 = sshll.u32 %s107_s25, 4  ;;  %v31_v3 = vmul.f32 %v30_v0, %v27_v1  ;;  %v32_v4 = vmul.f32 %v30_v0, %v28_v2  ;;  %s41_s26 = int_to_ptr.vmem [resolvable:$true] %s40_s26 }
  0x15   :  { %s78_s27 = scalar_lea.vmem %s41_s26, 256  ;;  %p83_p9 = scmp.lt.s32.totalorder %s41_s26, %s41_s26 }
  0x16   :  { %33 = vst [vmem:[#allocation6] sm:$0xff] %v31_v3  ;;  %34 = vst [vmem:[#allocation6 + $0x8] sm:$0xff] %v32_v4  ;;  %p79_p8 = scmp.ne.s32.totalorder %s41_s26, %s78_s27  ;;  %p84_p10 = scmp.lt.s32.totalorder %s78_s27, %s78_s27 }
  0x18   :  { %p85_p11 = por %p84_p10, %p83_p9 }
  0x1a   :  { %p86_p12 = pnand %p85_p11, %p79_p8 }
  0x1c   :  { %89 = shalt.err (!%p86_p12)
}
  0x1d   :  { %s90_s0 = scalar_lea.hbm %s158_s2, 256 }
  0x1e   :  { %p91_p13 = scmp.ne.s32.totalorder %s158_s2, %s90_s0  ;;  %p94_p0 = scmp.lt.u32.totalorder %s90_s0, %s158_s2 }
  0x20   :  { %p96_p1 = pnand %p94_p0, %p91_p13 }
  0x22   :  { %99 = shalt.err (!%p96_p1)
}
  0x23   :  { %46 = dma.vmem_to_hbm [thread:$0]  %s41_s26, 256, %s158_s2, [#allocation5], %s105_s19, %s105_s19, %s106_s20  }
  0x24   :  { %102 = dma.done.wait [#allocation5], 256  }
  0x25   :  { %103 = vsyncadd [#allocation5], 4294967040 }
  0x26   :  { %50 = vsyncpa [#allocation4], 1 }
  0x27   :  { %51 = vsyncpa [#allocation5], 1 }

</bundles_post_ra>
